<compile_context>
chip_gen: v6e
topology: v6e:2x2x1
jax: 0.10.0
libtpu: 0.0.40
codegen_flags: <defaults>
</compile_context>

<pallas_src>
import jax
import jax.numpy as jnp
import numpy as np
from jax.experimental import pallas as pl
from jax.experimental.pallas import tpu as pltpu


def _round_up(n: int, m: int) -> int:
    return ((n + m - 1) // m) * m


def _mlp_kernel(x_ref, w1_ref, b1_ref, w2_ref, b2_ref, o_ref):
    # linear1 on the MXU: (TB, F) bf16 @ (F, 20) bf16 -> f32 accumulation.
    h = jnp.dot(x_ref[...], w1_ref[...], preferred_element_type=jnp.float32)
    # bias + ReLU on the VPU, in f32.
    h = jnp.maximum(h + b1_ref[...], 0.0)
    # linear2 as (1, 20) @ (TB, 20)^T -> (1, TB): lane-dense result row straight
    # off the MXU (batch lands on the lane axis), exact f32 via HIGHEST precision.
    out_row = jax.lax.dot_general(
        w2_ref[...], h,
        dimension_numbers=(((1,), (1,)), ((), ())),
        preferred_element_type=jnp.float32,
        precision=jax.lax.Precision.HIGHEST,
    )
    out_row = out_row + b2_ref[0, 0]                  # scalar bias from SMEM
    o_ref[...] = out_row[None].astype(o_ref.dtype)    # (1, 1, TB) full-width store


def jet_rul_forward(x, w1, b1, w2, b2, *, block_b=1024, stream_dtype=jnp.bfloat16):
    """JetRulModel forward pass.

    x : (B, F) float32
    w1: (F, 20) float32   (torch linear1.weight transposed)
    b1: (1, 20) float32
    w2: (1, 20) float32   (torch linear2.weight, native layout)
    b2: (1, 1)  float32
    returns (B, 1) float32
    """
    B, F = x.shape
    H = w1.shape[1]

    # Batch tile: multiple of 128 so output rows are lane-dense; capped by block_b.
    tb = _round_up(min(block_b, _round_up(B, 128)), 128)
    b_pad = _round_up(B, tb)
    num_tiles = b_pad // tb

    if b_pad != B:
        x = jnp.pad(x, ((0, b_pad - B), (0, 0)))

    # Stream the dominant operands (x, w1) in bf16; keep the rest in f32.
    x_s = x.astype(stream_dtype)
    w1_s = w1.astype(stream_dtype)
    b1_f = b1.astype(jnp.float32)
    w2_f = w2.astype(jnp.float32)
    b2_f = b2.astype(jnp.float32)

    out = pl.pallas_call(
        _mlp_kernel,
        grid=(num_tiles,),
        in_specs=[
            # x: streamed per batch tile (double-buffered by the pipeline).
            pl.BlockSpec((tb, F), lambda i: (i, 0)),
            # Weights / biases: constant index_map -> fetched once, VMEM-resident.
            pl.BlockSpec((F, H), lambda i: (0, 0)),
            pl.BlockSpec((1, H), lambda i: (0, 0)),
            pl.BlockSpec((1, H), lambda i: (0, 0)),
            # linear2 bias: scalar in SMEM.
            pl.BlockSpec((1, 1), lambda i: (0, 0),
                         memory_space=pltpu.MemorySpace.SMEM),
        ],
        # Lane-dense output: one (1, 1, TB) row per grid step (batch on lanes).
        out_specs=pl.BlockSpec((1, 1, tb), lambda i: (i, 0, 0)),
        out_shape=jax.ShapeDtypeStruct((num_tiles, 1, tb), jnp.float32),
        compiler_params=pltpu.CompilerParams(
            dimension_semantics=("parallel",),     # v7x: shard batch tiles over both TCs
            vmem_limit_bytes=32 * 1024 * 1024,     # explicit budget, safe on v5e/v6e/v7x
        ),
    )(x_s, w1_s, b1_f, w2_f, b2_f)

    # Present the result in the module's (B, 1) layout (tile order == row order).
    return out.reshape(b_pad, 1)[:B]


def _init_params(key, no_of_features, hidden=20, out=1):
    # Deterministic init mimicking nn.Linear's uniform(-1/sqrt(fan_in), 1/sqrt(fan_in)).
    k1, k2, k3, k4 = jax.random.split(key, 4)
    bound1 = 1.0 / np.sqrt(no_of_features)
    bound2 = 1.0 / np.sqrt(hidden)
    w1 = jax.random.uniform(k1, (no_of_features, hidden), jnp.float32, -bound1, bound1)
    b1 = jax.random.uniform(k2, (1, hidden), jnp.float32, -bound1, bound1)
    w2 = jax.random.uniform(k3, (out, hidden), jnp.float32, -bound2, bound2)
    b2 = jax.random.uniform(k4, (1, out), jnp.float32, -bound2, bound2)
    return w1, b1, w2, b2


if __name__ == "__main__":
    key = jax.random.PRNGKey(0)
    k_x, k_p = jax.random.split(key)

    # Small shapes that still exercise a multi-step pipelined batch grid plus the
    # ragged-batch padding path (batch=300, block_b=128 -> 3 grid steps).
    batch = 300
    no_of_features = 24

    x = jax.random.normal(k_x, (batch, no_of_features), jnp.float32)
    w1, b1, w2, b2 = _init_params(k_p, no_of_features)

    out = jet_rul_forward(x, w1, b1, w2, b2, block_b=128)
    out = jax.block_until_ready(out)
    assert out.shape == (batch, 1)

    # Pure-numpy reference on the same bf16-rounded streamed operands.
    xb = np.asarray(x.astype(jnp.bfloat16).astype(jnp.float32))
    w1b = np.asarray(w1.astype(jnp.bfloat16).astype(jnp.float32))
    h_ref = np.maximum(xb @ w1b + np.asarray(b1), 0.0)
    ref = h_ref @ np.asarray(w2).T + np.asarray(b2)

    # Tolerance leaves slack for MXU accumulation-order / precision-pass differences
    # vs. the numpy f32 reference (observed error ~1e-5).
    np.testing.assert_allclose(np.asarray(out), ref, rtol=1e-2, atol=1e-2)

    print("KERNEL_OK")
</pallas_src>

<mosaic_0001>
module attributes {stable_mosaic.version = 11 : i64} {
  func.func @_mlp_kernel(%arg0: i32, %arg1: memref<128x24xbf16, #tpu.memory_space<vmem>>, %arg2: memref<24x20xbf16, #tpu.memory_space<vmem>>, %arg3: memref<1x20xf32, #tpu.memory_space<vmem>>, %arg4: memref<1x20xf32, #tpu.memory_space<vmem>>, %arg5: memref<1x1xf32, #tpu.memory_space<smem>>, %arg6: memref<1x1x128xf32, #tpu.memory_space<vmem>>) attributes {dimension_semantics = [#tpu.dimension_semantics<parallel>], iteration_bounds = array<i64: 3>, scalar_prefetch = 0 : i64, scratch_operands = 0 : i64, tpu.core_type = #tpu.core_type<tc>, window_params = [{transform_indices = @transform_0, window_bounds = array<i64: 128, 24>}, {pipeline_mode = #tpu.pipeline_mode<synchronous>, transform_indices = @transform_1, window_bounds = array<i64: 24, 20>}, {pipeline_mode = #tpu.pipeline_mode<synchronous>, transform_indices = @transform_2, window_bounds = array<i64: 1, 20>}, {pipeline_mode = #tpu.pipeline_mode<synchronous>, transform_indices = @transform_3, window_bounds = array<i64: 1, 20>}, {transform_indices = @transform_4, window_bounds = array<i64: 1, 1>}, {transform_indices = @transform_5, window_bounds = array<i64: 1, 1, 128>}]} {
    %c0 = arith.constant 0 : index
    %c0_0 = arith.constant 0 : index
    %0 = vector.load %arg1[%c0, %c0_0] : memref<128x24xbf16, #tpu.memory_space<vmem>>, vector<128x24xbf16>
    %c0_1 = arith.constant 0 : index
    %c0_2 = arith.constant 0 : index
    %1 = vector.load %arg2[%c0_1, %c0_2] : memref<24x20xbf16, #tpu.memory_space<vmem>>, vector<24x20xbf16>
    %cst = arith.constant dense<0.000000e+00> : vector<128x20xf32>
    %2 = tpu.matmul %0, %1, %cst {dimension_numbers = #tpu.dot_dimension_numbers<[1], [0], [0], [1], [0, 0, 1, 1], [], []>} : vector<128x24xbf16>, vector<24x20xbf16>, vector<128x20xf32> -> vector<128x20xf32>
    %c0_3 = arith.constant 0 : index
    %c0_4 = arith.constant 0 : index
    %3 = vector.load %arg3[%c0_3, %c0_4] : memref<1x20xf32, #tpu.memory_space<vmem>>, vector<1x20xf32>
    %4 = vector.broadcast %3 : vector<1x20xf32> to vector<128x20xf32>
    %5 = arith.addf %2, %4 : vector<128x20xf32>
    %cst_5 = arith.constant 0.000000e+00 : f32
    %6 = vector.broadcast %cst_5 : f32 to vector<128x20xf32>
    %7 = arith.maximumf %5, %6 : vector<128x20xf32>
    %c0_6 = arith.constant 0 : index
    %c0_7 = arith.constant 0 : index
    %8 = vector.load %arg4[%c0_6, %c0_7] : memref<1x20xf32, #tpu.memory_space<vmem>>, vector<1x20xf32>
    %cst_8 = arith.constant dense<0.000000e+00> : vector<1x128xf32>
    %9 = tpu.matmul %8, %7, %cst_8 {dimension_numbers = #tpu.dot_dimension_numbers<[1], [1], [0], [0], [0, 0, 1, 0], [], []>, precision = #tpu.contract_precision<fp32>} : vector<1x20xf32>, vector<128x20xf32>, vector<1x128xf32> -> vector<1x128xf32>
    %c0_9 = arith.constant 0 : index
    %c0_10 = arith.constant 0 : index
    %10 = memref.load %arg5[%c0_9, %c0_10] : memref<1x1xf32, #tpu.memory_space<smem>>
    %11 = vector.broadcast %10 : f32 to vector<1x128xf32>
    %12 = arith.addf %9, %11 : vector<1x128xf32>
    %13 = vector.shape_cast %12 : vector<1x128xf32> to vector<1x1x128xf32>
    %c0_11 = arith.constant 0 : index
    %c0_12 = arith.constant 0 : index
    %c0_13 = arith.constant 0 : index
    %14 = vector.load %arg6[%c0_11, %c0_12, %c0_13] : memref<1x1x128xf32, #tpu.memory_space<vmem>>, vector<1x1x128xf32>
    tpu.vector_store %arg6[%c0_11, %c0_12, %c0_13], %13 {strides = array<i32>} : memref<1x1x128xf32, #tpu.memory_space<vmem>>, vector<1x1x128xf32>,
    return
  }
  func.func @transform_0(%arg0: i32) -> (i32, i32) {
    %c0_i32 = arith.constant 0 : i32
    %c0_i32_0 = arith.constant 0 : i32
    return %arg0, %c0_i32 : i32, i32
  }
  func.func @transform_1(%arg0: i32) -> (i32, i32) {
    %c0_i32 = arith.constant 0 : i32
    %c0_i32_0 = arith.constant 0 : i32
    %c0_i32_1 = arith.constant 0 : i32
    return %c0_i32, %c0_i32_0 : i32, i32
  }
  func.func @transform_2(%arg0: i32) -> (i32, i32) {
    %c0_i32 = arith.constant 0 : i32
    %c0_i32_0 = arith.constant 0 : i32
    %c0_i32_1 = arith.constant 0 : i32
    return %c0_i32, %c0_i32_0 : i32, i32
  }
  func.func @transform_3(%arg0: i32) -> (i32, i32) {
    %c0_i32 = arith.constant 0 : i32
    %c0_i32_0 = arith.constant 0 : i32
    %c0_i32_1 = arith.constant 0 : i32
    return %c0_i32, %c0_i32_0 : i32, i32
  }
  func.func @transform_4(%arg0: i32) -> (i32, i32) {
    %c0_i32 = arith.constant 0 : i32
    %c0_i32_0 = arith.constant 0 : i32
    %c0_i32_1 = arith.constant 0 : i32
    return %c0_i32, %c0_i32_0 : i32, i32
  }
  func.func @transform_5(%arg0: i32) -> (i32, i32, i32) {
    %c0_i32 = arith.constant 0 : i32
    %c0_i32_0 = arith.constant 0 : i32
    %c0_i32_1 = arith.constant 0 : i32
    return %arg0, %c0_i32, %c0_i32_0 : i32, i32, i32
  }
}

</mosaic_0001>

<bundles_post_ra>
// kernel: tpu_custom_call.1
= control target key start
LH: loop header
LB: loop body
LE: loop exit
PB: predicated region body
PF: predicated region fallthrough
CT: control target
= control target key end

     0   :  { %s2259_s0 = inlined_call_operand.vmem [shape: bf16[384,24], index: 0, kind: input, shape index: {}]   ;;  %s2260_s1 = inlined_call_operand.vmem [shape: bf16[24,20], index: 1, kind: input, shape index: {}]   ;;  %s2261_s2 = inlined_call_operand.vmem [shape: f32[1,20], index: 2, kind: input, shape index: {}]   ;;  %s2262_s3 = inlined_call_operand.vmem [shape: f32[1,20], index: 3, kind: input, shape index: {}]   ;;  %s2263_s4 = inlined_call_operand.<no memory space> [shape: f32[1,1], index: 4, kind: input, shape index: {}]   ;;  %s2264_s5 = inlined_call_operand.hbm [shape: f32[3,1,128], index: 5, kind: output, shape index: {}]  }
   0x1   :  { %10 = sst [smem:[#allocation2]] %s2263_s4 }
   0x2   :  { %11 = vsyncpa [#allocation4], 0 }
   0x3   :  { %13 = vsyncpa [#allocation4 + $0x1], 0  ;;  %s1728_s20 = smov 0   ;;  %s1730_s21 = smov 0  }
   0x4   :  { %s1732_s22 = smov 0   ;;  %s1734_s23 = smov 0  }
   0x5 LB: > { %s1207_s4 = sadd.s32 4294967295, %s1690_s23   ;;  %s1208_s24 = sadd.s32 4294967294, %s1690_s23   ;;  %s1690_s23 = sphi %s1734_s23, %s2270_s23   ;;  %s1686_s22 = sphi %s1732_s22, %s2269_s22   ;;  %s1682_s21 = sphi %s1730_s21, %s2268_s21   ;;  %s1678_s20 = sphi %s1728_s20, %s2267_s20  }
   0x6   : > { %s1751_s25 = sadd.s32 1, %s1690_s23   ;;  %s136_s26 = sadd.s32 1, %s1686_s22 }
   0x7   : > { %s133_s27 = ssub.s32 %s1690_s23, %s1751_s25  ;;  %p146_p0 = scmp.ne.s32.totalorder %s1686_s22, %s1682_s21 }
   0x8   : > { %p134_p1 = scmp.eq.s32.totalorder %s133_s27, 0  ;;  %p147_p2 = scmp.eq.s32.totalorder %s1207_s4, 2 }
   0x9   : > { %p152_p3 = scmp.ne.s32.totalorder %s1682_s21, %s1678_s20  ;;  %p153_p4 = scmp.eq.s32.totalorder %s1208_s24, 2 }
   0xa   : > { %s1761_s28 = scalar_select %p134_p1, %s1686_s22, %s136_s26  }
   0xb   : > { %p1763_p5 = por %p147_p2, %p146_p0  ;;  %p1767_p6 = por %p153_p4, %p152_p3 }
   0xc   : > { %p1211_p7 = scmp.ge.s32.totalorder %s1690_s23, 1  ;;  %p192_p8 = scmp.lt.s32.totalorder %s1690_s23, 4 }
   0xe   : > { %p193_p9 = pnand %p1211_p7, %p192_p8 }
   0xf   : > { %s1779_s10 = sshll.u32 (!%p193_p9), %s1207_s4, 4  ;;  %s444_s4 = sld [smem:[#allocation2]] (!%p193_p9) }
  0x10   : > { %196 = sbr.rel (%p193_p9) target bundleno = 665 (0x299), region = 40  ;;  %p220_p10 = scmp.lt.s32.totalorder (!%p193_p9), %s1779_s10, 47 }
  0x11   : > { %s217_s24 = sand.u32 (!%p193_p9), 1, %s1682_s21   ;;  %s2224_s8 = scalar_lea.hbm (!%p193_p9), %s2264_s5, %s1779_s10 }
  0x12   : > { %s218_s26 = scalar_lea.vmem (!%p193_p9), [#allocation3], %s217_s24  ;;  %s1141_s9 = scalar_lea.sflag (!%p193_p9), [#allocation4], %s217_s24 }
  0x13   : > { %s1153_s27 = sshll.u32 (!%p193_p9), %s218_s26, 4  ;;  %s1154_s27 = int_to_ptr.vmem [resolvable:$true] %s1153_s27 }
  0x15   : > { %v1620_v0 = vld [vmem:[%s2260_s1 + $0x8] ss:$0 sps:$4 sm:$0xff]   ;;  %vm326_vm0 = vcmask 1043456   ;;  %v1621_v1 = vld [vmem:[%s2260_s1] sm:$0xff]   ;;  %s221_s11 = scalar_select %p220_p10, %s1779_s10, 47  ;;  %vm301_vm1 = vcmask 195584  }
  0x16   : > { %1578 = vmatprep.subr.msk.bf16.mxu0 %vm326_vm0, %v1620_v0  ;;  %v328_v2 = vsel %vm326_vm0, %v1620_v0, 0  ;;  %v1692_v11 = vmov 0.0   ;;  %vm1693_vm2 = vmmov 0   ;;  %v1817_v24 = vld [vmem:[%s2261_s2] ss:$0 sm:$0xff]  ;;  %vm446_vm3 = vcmask 162816  }
  0x17   : > { %1349 = vmatpush3.bf16.msra.mxu0 %v328_v2  ;;  %s1213_s12 = sshll.u32 %s221_s11, 2  ;;  %1368 = vmatprep.subr.mxu1 %v1692_v11  ;;  %s1630_s11 = scalar_lea.vmem %s1154_s27, 16 }
  0x18   : > { %1350 = vmatprep.subr.bf16.mxu0 %v1621_v1  ;;  %s223_s15 = scalar_lea.vmem %s2259_s0, %s1213_s12  ;;  %1400 = vmatprep.mubr.msk.f32.mxu1 %vm1693_vm2, %v1692_v11  ;;  %p1631_p11 = scmp.ne.s32.totalorder %s1154_s27, %s1630_s11 }
  0x19   : > { %v1622_v3 = vld [vmem:[%s223_s15] sm:$0xff]   ;;  %v1623_v4 = vld [vmem:[%s223_s15 + $0x8] sm:$0xff]   ;;  %v1624_v5 = vld [vmem:[%s223_s15 + $0x10] sm:$0xff]   ;;  %s1694_s12 = smov [#allocation3]  }
  0x1a   : > { %1352 = vmatprep.mubr.msk.bf16.mxu0 %vm301_vm1, %v1622_v3  ;;  %v1625_v6 = vld [vmem:[%s223_s15 + $0x18] sm:$0xff]   ;;  %v1626_v7 = vld [vmem:[%s223_s15 + $0x20] sm:$0xff]   ;;  %v1627_v8 = vld [vmem:[%s223_s15 + $0x28] sm:$0xff]   ;;  %p1632_p12 = pnand %p1631_p11, %p1763_p5  ;;  %s1634_s13 = sshll.u32 %s1694_s12, 4  ;;  %s1635_s13 = int_to_ptr.vmem [resolvable:$false] %s1634_s13 }
  0x1b   : > { %1351 = vmatpush3.bf16.msra.mxu0 %v1621_v1  ;;  %v1628_v9 = vld [vmem:[%s223_s15 + $0x30] sm:$0xff]   ;;  %v1629_v10 = vld [vmem:[%s223_s15 + $0x38] sm:$0xff]   ;;  %s1636_s14 = scalar_lea.vmem %s1635_s13, 32  ;;  %p1637_p0 = scmp.lt.s32.totalorder %s1154_s27, %s1635_s13 }
  0x1c   : > { %1403 = vmatprep.subr.mxu0 %v1692_v11  ;;  %p1633_p13 = pneg %p1632_p12  ;;  %p1638_p1 = scmp.lt.s32.totalorder %s1636_s14, %s1630_s11 }
  0x1e   : > { %1353 = vmatmul.mubr.msk.bf16.vlgmr.msra.gmra.mxu0 %vm301_vm1, %v1623_v4  ;;  %p1639_p2 = por %p1638_p1, %p1637_p0 }
  0x1f   : > { %1356 = vmatprep.mubr.msk.bf16.mxu0 %vm301_vm1, %v1624_v5 }
  0x20   : > { %p1640_p3 = pnand %p1639_p2, %p1633_p13 }
  0x26   : > { %1357 = vmatmul.mubr.msk.bf16.gmra.mxu0 %vm301_vm1, %v1625_v6 }
  0x27   : > { %1360 = vmatprep.mubr.msk.bf16.mxu0 %vm301_vm1, %v1626_v7 }
  0x2e   : > { %1361 = vmatmul.mubr.msk.bf16.gmra.mxu0 %vm301_vm1, %v1627_v8 }
  0x2f   : > { %1364 = vmatprep.mubr.msk.bf16.mxu0 %vm301_vm1, %v1628_v9 }
  0x36   : > { %1365 = vmatmul.mubr.msk.bf16.gmra.mxu0 %vm301_vm1, %v1629_v10 }
  0x37   : > { %1435 = vmatprep.mubr.msk.f32.mxu0 %vm1693_vm2, %v1692_v11 }
  0xde   : > { %v1800_v12 = vpop.f32.mrf.mxu0 }
  0xe0   : > { %v1802_v13 = vpop.f32.mrf.mxu0 }
  0xe2   : > { %v1804_v14 = vpop.f32.mrf.mxu0 }
  0xe4   : > { %v1806_v15 = vpop.f32.mrf.mxu0 }
  0xe6   : > { %v1808_v16 = vpop.f32.mrf.mxu0 }
  0xe7   : > { %v389_v9 = vadd.f32 %v1808_v16, %v1817_v24 }
  0xe8   : > { %v1810_v17 = vpop.f32.mrf.mxu0 }
  0xe9   : > { %v433_v16 = vmax.f32 %v389_v9, 0.0 }
  0xea   : > { %v1359_v18 = vpop.f32.mrf.mxu0 }
  0xeb   : > { %v392_v1 = vadd.f32 %v1359_v18, %v1817_v24 }
  0xec   : > { %v1812_v19 = vpop.f32.mrf.mxu0 }
  0xed   : > { %v434_v10 = vmax.f32 %v392_v1, 0.0 }
  0xee   : > { %v1362_v20 = vpop.f32.mrf.mxu0 }
  0xef   : > { %v405_v39 = vadd.f32 %v1362_v20, %v1817_v24 }
  0xf0   : > { %v396_v21 = vpop.f32.mrf.mxu0 }
  0xf1   : > { %v437_v49 = vmax.f32 %v405_v39, 0.0  ;;  %v397_v58 = vadd.f32 %v1817_v24, %v396_v21 }
  0xf2   : > { %v1363_v22 = vpop.f32.mrf.mxu0 }
  0xf3   : > { %v408_v31 = vadd.f32 %v1363_v22, %v1817_v24  ;;  %v481_v57 = vsel %vm446_vm3, %v437_v49, 0  ;;  %v435_v3 = vmax.f32 %v397_v58, 0.0 }
  0xf4   : > { %v399_v23 = vpop.f32.mrf.mxu0  ;;  %v1870_v2 = vand.u32 4294901760, %v481_v57 }
  0xf5   : > { %v438_v40 = vmax.f32 %v408_v31, 0.0  ;;  %v400_v55 = vadd.f32 %v1817_v24, %v399_v23  ;;  %v475_v20 = vsel %vm446_vm3, %v435_v3, 0 }
  0xf6   : > { %v1366_v25 = vpop.f32.mrf.mxu0  ;;  %v1886_v18 = vsub.f32 %v481_v57, %v1870_v2 }
  0xf7   : > { %v421_v26 = vadd.f32 %v1366_v25, %v1817_v24  ;;  %v484_v50 = vsel %vm446_vm3, %v438_v40, 0  ;;  %v436_v0 = vmax.f32 %v400_v55, 0.0 }
  0xf8   : > { %v412_v27 = vpop.f32.mrf.mxu0  ;;  %v1858_v59 = vand.u32 4294901760, %v484_v50 }
  0xf9   : > { %v441_v28 = vmax.f32 %v421_v26, 0.0  ;;  %v413_v29 = vadd.f32 %v1817_v24, %v412_v27  ;;  %v478_v8 = vsel %vm446_vm3, %v436_v0, 0  ;;  %v472_v26 = vsel %vm446_vm3, %v434_v10, 0 }
  0xfa   : > { %v1367_v30 = vpop.f32.mrf.mxu0  ;;  %v1875_v4 = vsub.f32 %v484_v50, %v1858_v59  ;;  %v1892_v22 = vand.u32 4294901760, %v478_v8  ;;  %v1899_v27 = vand.u32 4294901760, %v475_v20 }
  0xfb   : > { %v493_v32 = vsel %vm446_vm3, %v441_v28, 0  ;;  %v424_v33 = vadd.f32 %v1367_v30, %v1817_v24  ;;  %v439_v36 = vmax.f32 %v413_v29, 0.0  ;;  %v627_v28 = vand.u32 4294901760, %v1886_v18 }
  0xfc   : > { %v1824_v34 = vand.u32 4294901760, %v493_v32  ;;  %v415_v35 = vpop.f32.mrf.mxu0  ;;  %v620_v21 = vand.u32 4294901760, %v1875_v4  ;;  %v1905_v29 = vsub.f32 %v478_v8, %v1892_v22 }
  0xfd   : > { %v442_v37 = vmax.f32 %v424_v33, 0.0  ;;  %v416_v38 = vadd.f32 %v1817_v24, %v415_v35  ;;  %v487_v45 = vsel %vm446_vm3, %v439_v36, 0  ;;  %v469_v33 = vsel %vm446_vm3, %v433_v16, 0 }
  0xfe   : > { %v1830_v43 = vsub.f32 %v493_v32, %v1824_v34  ;;  %v1845_v52 = vand.u32 4294901760, %v487_v45  ;;  %v621_v31 = vsub.f32 %v1875_v4, %v620_v21  ;;  %v384_v32 = vadd.f32 %v1817_v24, %v1812_v19 }
  0xff   : > { %v496_v41 = vsel %vm446_vm3, %v442_v37, 0  ;;  %v440_v42 = vmax.f32 %v416_v38, 0.0  ;;  %v381_v35 = vadd.f32 %v1817_v24, %v1810_v17  ;;  %v1916_v36 = vand.u32 4294901760, %v472_v26 }
 0x100   : > { %v1832_v44 = vand.u32 4294901760, %v496_v41  ;;  %v599_v51 = vand.u32 4294901760, %v1830_v43  ;;  %v1862_v60 = vsub.f32 %v487_v45, %v1845_v52  ;;  %v1921_v37 = vsub.f32 %v475_v20, %v1899_v27 }
 0x101   : > { %v490_v46 = vsel %vm446_vm3, %v440_v42, 0  ;;  %v634_v38 = vand.u32 4294901760, %v1905_v29  ;;  %v622_v19 = vand.u32 4294901760, %v621_v31  ;;  %v628_v39 = vsub.f32 %v1886_v18, %v627_v28 }
 0x102   : > { %v1837_v47 = vsub.f32 %v496_v41, %v1832_v44  ;;  %v1839_v48 = vand.u32 4294901760, %v490_v46  ;;  %1369 = vmatpush3.xpose.msra.mxu1 %v1832_v44  ;;  %v600_v63 = vsub.f32 %v1830_v43, %v599_v51  ;;  %v613_v5 = vand.u32 4294901760, %v1862_v60 }
 0x103   : > { %1370 = vmatprep.subr.mxu1 %v1692_v11  ;;  %v432_v40 = vmax.f32 %v384_v32, 0.0  ;;  %v376_v17 = vadd.f32 %v1804_v14, %v1817_v24  ;;  %v1930_v41 = vand.u32 4294901760, %v469_v33  ;;  %v431_v42 = vmax.f32 %v381_v35, 0.0 }
 0x104   : > { %v592_v53 = vand.u32 4294901760, %v1837_v47  ;;  %v1849_v54 = vsub.f32 %v490_v46, %v1839_v48  ;;  %v601_v6 = vand.u32 4294901760, %v600_v63  ;;  %v614_v25 = vsub.f32 %v1862_v60, %v613_v5 }
 0x105   : > { %v1935_v45 = vsub.f32 %v472_v26, %v1916_v36  ;;  %v641_v46 = vand.u32 4294901760, %v1921_v37  ;;  %v629_v49 = vand.u32 4294901760, %v628_v39  ;;  %v635_v50 = vsub.f32 %v1905_v29, %v634_v38  ;;  %v443_v26 = vld [vmem:[%s2262_s3] sm:$0x1] }
 0x106   : > { %1371 = vmatpush3.xpose.msra.mxu1 %v1824_v34  ;;  %v593_v56 = vsub.f32 %v1837_v47, %v592_v53  ;;  %v606_v61 = vand.u32 4294901760, %v1849_v54  ;;  %v615_v30 = vand.u32 4294901760, %v614_v25  ;;  %v466_v55 = vsel %vm446_vm3, %v432_v40, 0 }
 0x107   : > { %1372 = vmatprep.subr.mxu1 %v1692_v11  ;;  %v373_v14 = vadd.f32 %v1800_v12, %v1817_v24  ;;  %v1946_v57 = vsub.f32 %v469_v33, %v1930_v41  ;;  %v463_v58 = vsel %vm446_vm3, %v431_v42, 0  ;;  %v1952_v63 = vand.u32 4294901760, %v466_v55 }
 0x108   : > { %v594_v62 = vand.u32 4294901760, %v593_v56  ;;  %v607_v7 = vsub.f32 %v1849_v54, %v606_v61  ;;  %v430_v56 = vmax.f32 %v376_v17, 0.0  ;;  %v636_v0 = vand.u32 4294901760, %v635_v50 }
 0x109   : > { %v642_v1 = vsub.f32 %v1921_v37, %v641_v46  ;;  %v429_v12 = vmax.f32 %v373_v14, 0.0  ;;  %v1965_v8 = vsub.f32 %v466_v55, %v1952_v63  ;;  %v368_v20 = vadd.f32 %v1817_v24, %v1806_v15 }
 0x10a   : > { %1373 = vmatpush3.xpose.msra.mxu1 %v1839_v48  ;;  %1404 = vmatpush3.xpose.msra.mxu0 %v594_v62  ;;  %v608_v23 = vand.u32 4294901760, %v607_v7  ;;  %v648_v62 = vand.u32 4294901760, %v1935_v45  ;;  %v460_v3 = vsel %vm446_vm3, %v430_v56, 0  ;;  %v655_v7 = vand.u32 4294901760, %v1946_v57 }
 0x10b   : > { %1374 = vmatprep.subr.mxu1 %v1692_v11  ;;  %1405 = vmatprep.subr.mxu0 %v1692_v11  ;;  %v643_v9 = vand.u32 4294901760, %v642_v1  ;;  %v365_v25 = vadd.f32 %v1817_v24, %v1802_v13  ;;  %v1976_v16 = vand.u32 4294901760, %v460_v3  ;;  %v428_v24 = vmax.f32 %v368_v20, 0.0 }
 0x10c   : > { %v649_v10 = vsub.f32 %v1935_v45, %v648_v62  ;;  %v656_v13 = vsub.f32 %v1946_v57, %v655_v7  ;;  %v448_v32 = vsel %vm446_vm3, %v443_v26, 0 }
 0x10d   : > { %v427_v35 = vmax.f32 %v365_v25, 0.0  ;;  %v454_v42 = vsel %vm446_vm3, %v428_v24, 0 }
 0x10e   : > { %1375 = vmatpush3.xpose.msra.mxu1 %v1845_v52  ;;  %1406 = vmatpush3.xpose.msra.mxu0 %v601_v6  ;;  %v1959_v6 = vand.u32 4294901760, %v463_v58  ;;  %v650_v31 = vand.u32 4294901760, %v649_v10  ;;  %v657_v40 = vand.u32 4294901760, %v656_v13  ;;  %v2014_v56 = vand.u32 4294901760, %v454_v42 }
 0x10f   : > { %1376 = vmatprep.subr.mxu1 %v1692_v11  ;;  %1407 = vmatprep.subr.mxu0 %v1692_v11  ;;  %v451_v55 = vsel %vm446_vm3, %v427_v35, 0 }
 0x110   : > { %v1984_v15 = vsub.f32 %v463_v58, %v1959_v6 }
 0x112   : > { %1377 = vmatpush3.xpose.msra.mxu1 %v1858_v59  ;;  %1408 = vmatpush3.xpose.msra.mxu0 %v608_v23  ;;  %v457_v23 = vsel %vm446_vm3, %v429_v12, 0  ;;  %v669_v39 = vand.u32 4294901760, %v1984_v15  ;;  %v2023_v12 = vand.u32 4294901760, %v451_v55 }
 0x113   : > { %1378 = vmatprep.subr.mxu1 %v1692_v11  ;;  %1409 = vmatprep.subr.mxu0 %v1692_v11  ;;  %v1992_v33 = vand.u32 4294901760, %v457_v23 }
 0x114   : > { %v2039_v25 = vsub.f32 %v451_v55, %v2023_v12 }
 0x115   : > { %v2008_v50 = vsub.f32 %v457_v23, %v1992_v33 }
 0x116   : > { %1379 = vmatpush3.xpose.msra.mxu1 %v1870_v2  ;;  %1410 = vmatpush3.xpose.msra.mxu0 %v615_v30  ;;  %v662_v30 = vand.u32 4294901760, %v1965_v8 }
 0x117   : > { %1380 = vmatprep.subr.mxu1 %v1692_v11  ;;  %1411 = vmatprep.subr.mxu0 %v1692_v11 }
 0x118   : > { %v663_v17 = vsub.f32 %v1965_v8, %v662_v30 }
 0x11a   : > { %1381 = vmatpush3.xpose.msra.mxu1 %v1892_v22  ;;  %1412 = vmatpush3.xpose.msra.mxu0 %v622_v19  ;;  %v1997_v19 = vsub.f32 %v460_v3, %v1976_v16  ;;  %v664_v58 = vand.u32 4294901760, %v663_v17  ;;  %v683_v3 = vand.u32 4294901760, %v2008_v50 }
 0x11b   : > { %1382 = vmatprep.subr.mxu1 %v1692_v11  ;;  %1413 = vmatprep.subr.mxu0 %v1692_v11 }
 0x11c   : > { %v676_v14 = vand.u32 4294901760, %v1997_v19  ;;  %v684_v13 = vsub.f32 %v2008_v50, %v683_v3 }
 0x11e   : > { %1383 = vmatpush3.xpose.msra.mxu1 %v1899_v27  ;;  %1414 = vmatpush3.xpose.msra.mxu0 %v629_v49  ;;  %v2004_v49 = vand.u32 4294901760, %v448_v32  ;;  %v677_v20 = vsub.f32 %v1997_v19, %v676_v14  ;;  %v685_v35 = vand.u32 4294901760, %v684_v13 }
 0x11f   : > { %1384 = vmatprep.subr.mxu1 %v1692_v11  ;;  %1415 = vmatprep.subr.mxu0 %v1692_v11 }
 0x120   : > { %v2020_v1 = vsub.f32 %v448_v32, %v2004_v49  ;;  %v697_v32 = vand.u32 4294901760, %v2039_v25 }
 0x122   : > { %1385 = vmatpush3.xpose.msra.mxu1 %v1916_v36  ;;  %1416 = vmatpush3.xpose.msra.mxu0 %v636_v0  ;;  %v670_v0 = vsub.f32 %v1984_v15, %v669_v39  ;;  %v581_v23 = vand.u32 4294901760, %v2020_v1  ;;  %v698_v55 = vsub.f32 %v2039_v25, %v697_v32 }
 0x123   : > { %1386 = vmatprep.subr.mxu1 %v1692_v11  ;;  %1417 = vmatprep.subr.mxu0 %v1692_v11 }
 0x124   : > { %v671_v10 = vand.u32 4294901760, %v670_v0  ;;  %v582_v24 = vsub.f32 %v2020_v1, %v581_v23 }
 0x126   : > { %1387 = vmatpush3.xpose.msra.mxu1 %v1930_v41  ;;  %1418 = vmatpush3.xpose.msra.mxu0 %v643_v9  ;;  %v2029_v9 = vsub.f32 %v454_v42, %v2014_v56  ;;  %v583_v17 = vand.u32 4294901760, %v582_v24 }
 0x127   : > { %1388 = vmatprep.subr.mxu1 %v1692_v11  ;;  %1419 = vmatprep.subr.mxu0 %v1692_v11 }
 0x128   : > { %v690_v26 = vand.u32 4294901760, %v2029_v9 }
 0x12a   : > { %1389 = vmatpush3.xpose.msra.mxu1 %v1952_v63  ;;  %1420 = vmatpush3.xpose.msra.mxu0 %v650_v31  ;;  %v678_v31 = vand.u32 4294901760, %v677_v20 }
 0x12b   : > { %1390 = vmatprep.subr.mxu1 %v1692_v11  ;;  %1421 = vmatprep.subr.mxu0 %v1692_v11 }
 0x12e   : > { %1391 = vmatpush3.xpose.msra.mxu1 %v1959_v6  ;;  %1422 = vmatpush3.xpose.msra.mxu0 %v657_v40  ;;  %v691_v40 = vsub.f32 %v2029_v9, %v690_v26 }
 0x12f   : > { %1392 = vmatprep.subr.mxu1 %v1692_v11  ;;  %1423 = vmatprep.subr.mxu0 %v1692_v11 }
 0x130   : > { %v692_v42 = vand.u32 4294901760, %v691_v40 }
 0x132   : > { %1393 = vmatpush3.xpose.msra.mxu1 %v1976_v16  ;;  %1424 = vmatpush3.xpose.msra.mxu0 %v664_v58  ;;  %v699_v58 = vand.u32 4294901760, %v698_v55 }
 0x133   : > { %1394 = vmatprep.subr.mxu1 %v1692_v11  ;;  %1425 = vmatprep.subr.mxu0 %v1692_v11 }
 0x136   : > { %1395 = vmatpush3.xpose.msra.mxu1 %v1992_v33  ;;  %1426 = vmatpush3.xpose.msra.mxu0 %v671_v10 }
 0x137   : > { %1396 = vmatprep.subr.mxu1 %v1692_v11  ;;  %1427 = vmatprep.subr.mxu0 %v1692_v11 }
 0x13a   : > { %1397 = vmatpush3.xpose.msra.mxu1 %v2014_v56  ;;  %1428 = vmatpush3.xpose.msra.mxu0 %v678_v31 }
 0x13b   : > { %1398 = vmatprep.subr.mxu1 %v1692_v11  ;;  %1429 = vmatprep.subr.mxu0 %v1692_v11 }
 0x13e   : > { %1399 = vmatpush3.xpose.msra.mxu1 %v2023_v12  ;;  %1430 = vmatpush3.xpose.msra.mxu0 %v685_v35 }
 0x13f   : > { %1431 = vmatprep.subr.mxu0 %v1692_v11  ;;  %1438 = vmatprep.subr.mxu1 %v1692_v11 }
 0x141   : > { %1401 = vmatmul.mubr.f32.vlgmr.msra.gmra.mxu1 %v583_v17 }
 0x142   : > { %1432 = vmatpush3.xpose.msra.mxu0 %v692_v42  ;;  %1439 = vmatpush3.xpose.msra.mxu1 %v1837_v47 }
 0x143   : > { %1433 = vmatprep.subr.mxu0 %v1692_v11  ;;  %1440 = vmatprep.subr.mxu1 %v1692_v11 }
 0x144   : > { %1470 = vmatprep.mubr.msk.f32.mxu1 %vm1693_vm2, %v1692_v11 }
 0x146   : > { %1434 = vmatpush3.xpose.msra.mxu0 %v699_v58  ;;  %1441 = vmatpush3.xpose.msra.mxu1 %v1830_v43  ;;  %v445_v43 = vstv %s444_s4 }
 0x147   : > { %1442 = vmatprep.subr.mxu1 %v1692_v11  ;;  %1473 = vmatprep.subr.mxu0 %v1692_v11 }
 0x149   : > { %1436 = vmatmul.mubr.f32.vlgmr.msra.gmra.mxu0 %v2004_v49 }
 0x14a   : > { %1443 = vmatpush3.xpose.msra.mxu1 %v1849_v54  ;;  %1474 = vmatpush3.xpose.msra.mxu0 %v1832_v44 }
 0x14b   : > { %1444 = vmatprep.subr.mxu1 %v1692_v11  ;;  %1475 = vmatprep.subr.mxu0 %v1692_v11 }
 0x14c   : > { %1505 = vmatprep.mubr.msk.f32.mxu0 %vm1693_vm2, %v1692_v11 }
 0x14e   : > { %1445 = vmatpush3.xpose.msra.mxu1 %v1862_v60  ;;  %1476 = vmatpush3.xpose.msra.mxu0 %v1824_v34 }
 0x14f   : > { %1446 = vmatprep.subr.mxu1 %v1692_v11  ;;  %1477 = vmatprep.subr.mxu0 %v1692_v11 }
 0x152   : > { %1447 = vmatpush3.xpose.msra.mxu1 %v1875_v4  ;;  %1478 = vmatpush3.xpose.msra.mxu0 %v1839_v48 }
 0x153   : > { %1448 = vmatprep.subr.mxu1 %v1692_v11  ;;  %1479 = vmatprep.subr.mxu0 %v1692_v11 }
 0x156   : > { %1449 = vmatpush3.xpose.msra.mxu1 %v1886_v18  ;;  %1480 = vmatpush3.xpose.msra.mxu0 %v1845_v52 }
 0x157   : > { %1450 = vmatprep.subr.mxu1 %v1692_v11  ;;  %1481 = vmatprep.subr.mxu0 %v1692_v11 }
 0x15a   : > { %1451 = vmatpush3.xpose.msra.mxu1 %v1905_v29  ;;  %1482 = vmatpush3.xpose.msra.mxu0 %v1858_v59 }
 0x15b   : > { %1452 = vmatprep.subr.mxu1 %v1692_v11  ;;  %1483 = vmatprep.subr.mxu0 %v1692_v11 }
 0x15e   : > { %1453 = vmatpush3.xpose.msra.mxu1 %v1921_v37  ;;  %1484 = vmatpush3.xpose.msra.mxu0 %v1870_v2 }
 0x15f   : > { %1454 = vmatprep.subr.mxu1 %v1692_v11  ;;  %1485 = vmatprep.subr.mxu0 %v1692_v11 }
 0x162   : > { %1455 = vmatpush3.xpose.msra.mxu1 %v1935_v45  ;;  %1486 = vmatpush3.xpose.msra.mxu0 %v1892_v22 }
 0x163   : > { %1456 = vmatprep.subr.mxu1 %v1692_v11  ;;  %1487 = vmatprep.subr.mxu0 %v1692_v11 }
 0x166   : > { %1457 = vmatpush3.xpose.msra.mxu1 %v1946_v57  ;;  %1488 = vmatpush3.xpose.msra.mxu0 %v1899_v27 }
 0x167   : > { %1458 = vmatprep.subr.mxu1 %v1692_v11  ;;  %1489 = vmatprep.subr.mxu0 %v1692_v11 }
 0x16a   : > { %1459 = vmatpush3.xpose.msra.mxu1 %v1965_v8  ;;  %1490 = vmatpush3.xpose.msra.mxu0 %v1916_v36 }
 0x16b   : > { %1460 = vmatprep.subr.mxu1 %v1692_v11  ;;  %1491 = vmatprep.subr.mxu0 %v1692_v11 }
 0x16e   : > { %1461 = vmatpush3.xpose.msra.mxu1 %v1984_v15  ;;  %1492 = vmatpush3.xpose.msra.mxu0 %v1930_v41 }
 0x16f   : > { %1462 = vmatprep.subr.mxu1 %v1692_v11  ;;  %1493 = vmatprep.subr.mxu0 %v1692_v11 }
 0x172   : > { %1463 = vmatpush3.xpose.msra.mxu1 %v1997_v19  ;;  %1494 = vmatpush3.xpose.msra.mxu0 %v1952_v63 }
 0x173   : > { %1464 = vmatprep.subr.mxu1 %v1692_v11  ;;  %1495 = vmatprep.subr.mxu0 %v1692_v11 }
 0x176   : > { %1465 = vmatpush3.xpose.msra.mxu1 %v2008_v50  ;;  %1496 = vmatpush3.xpose.msra.mxu0 %v1959_v6 }
 0x177   : > { %1466 = vmatprep.subr.mxu1 %v1692_v11  ;;  %1497 = vmatprep.subr.mxu0 %v1692_v11 }
 0x17a   : > { %1467 = vmatpush3.xpose.msra.mxu1 %v2029_v9  ;;  %1498 = vmatpush3.xpose.msra.mxu0 %v1976_v16 }
 0x17b   : > { %1468 = vmatprep.subr.mxu1 %v1692_v11  ;;  %1499 = vmatprep.subr.mxu0 %v1692_v11 }
 0x17e   : > { %1469 = vmatpush3.xpose.msra.mxu1 %v2039_v25  ;;  %1500 = vmatpush3.xpose.msra.mxu0 %v1992_v33 }
 0x17f   : > { %1501 = vmatprep.subr.mxu0 %v1692_v11  ;;  %1508 = vmatprep.subr.mxu1 %v1692_v11 }
 0x181   : > { %1471 = vmatmul.mubr.f32.vlgmr.msra.gmra.mxu1 %v2020_v1 }
 0x182   : > { %1502 = vmatpush3.xpose.msra.mxu0 %v2014_v56  ;;  %1509 = vmatpush3.xpose.msra.mxu1 %v592_v53 }
 0x183   : > { %1503 = vmatprep.subr.mxu0 %v1692_v11  ;;  %1510 = vmatprep.subr.mxu1 %v1692_v11 }
 0x184   : > { %1540 = vmatprep.mubr.msk.f32.mxu1 %vm1693_vm2, %v1692_v11 }
 0x186   : > { %1504 = vmatpush3.xpose.msra.mxu0 %v2023_v12  ;;  %1511 = vmatpush3.xpose.msra.mxu1 %v599_v51 }
 0x187   : > { %1512 = vmatprep.subr.mxu1 %v1692_v11  ;;  %1543 = vmatprep.subr.mxu0 %v1692_v11 }
 0x189   : > { %1506 = vmatmul.mubr.f32.vlgmr.msra.gmra.mxu0 %v581_v23 }
 0x18a   : > { %1513 = vmatpush3.xpose.msra.mxu1 %v606_v61  ;;  %1544 = vmatpush3.xpose.msra.mxu0 %v1832_v44 }
 0x18b   : > { %1514 = vmatprep.subr.mxu1 %v1692_v11  ;;  %1545 = vmatprep.subr.mxu0 %v1692_v11 }
 0x18c   : > { %1575 = vmatprep.mubr.msk.f32.mxu0 %vm1693_vm2, %v1692_v11 }
 0x18e   : > { %1515 = vmatpush3.xpose.msra.mxu1 %v613_v5  ;;  %1546 = vmatpush3.xpose.msra.mxu0 %v1824_v34 }
 0x18f   : > { %1516 = vmatprep.subr.mxu1 %v1692_v11  ;;  %1547 = vmatprep.subr.mxu0 %v1692_v11 }
 0x192   : > { %1517 = vmatpush3.xpose.msra.mxu1 %v620_v21  ;;  %1548 = vmatpush3.xpose.msra.mxu0 %v1839_v48 }
 0x193   : > { %1518 = vmatprep.subr.mxu1 %v1692_v11  ;;  %1549 = vmatprep.subr.mxu0 %v1692_v11 }
 0x196   : > { %1519 = vmatpush3.xpose.msra.mxu1 %v627_v28  ;;  %1550 = vmatpush3.xpose.msra.mxu0 %v1845_v52 }
 0x197   : > { %1520 = vmatprep.subr.mxu1 %v1692_v11  ;;  %1551 = vmatprep.subr.mxu0 %v1692_v11 }
 0x19a   : > { %1521 = vmatpush3.xpose.msra.mxu1 %v634_v38  ;;  %1552 = vmatpush3.xpose.msra.mxu0 %v1858_v59 }
 0x19b   : > { %1522 = vmatprep.subr.mxu1 %v1692_v11  ;;  %1553 = vmatprep.subr.mxu0 %v1692_v11 }
 0x19e   : > { %1523 = vmatpush3.xpose.msra.mxu1 %v641_v46  ;;  %1554 = vmatpush3.xpose.msra.mxu0 %v1870_v2 }
 0x19f   : > { %1524 = vmatprep.subr.mxu1 %v1692_v11  ;;  %1555 = vmatprep.subr.mxu0 %v1692_v11 }
 0x1a2   : > { %1525 = vmatpush3.xpose.msra.mxu1 %v648_v62  ;;  %1556 = vmatpush3.xpose.msra.mxu0 %v1892_v22 }
 0x1a3   : > { %1526 = vmatprep.subr.mxu1 %v1692_v11  ;;  %1557 = vmatprep.subr.mxu0 %v1692_v11 }
 0x1a6   : > { %1527 = vmatpush3.xpose.msra.mxu1 %v655_v7  ;;  %1558 = vmatpush3.xpose.msra.mxu0 %v1899_v27 }
 0x1a7   : > { %1528 = vmatprep.subr.mxu1 %v1692_v11  ;;  %1559 = vmatprep.subr.mxu0 %v1692_v11 }
 0x1aa   : > { %1529 = vmatpush3.xpose.msra.mxu1 %v662_v30  ;;  %1560 = vmatpush3.xpose.msra.mxu0 %v1916_v36 }
 0x1ab   : > { %1530 = vmatprep.subr.mxu1 %v1692_v11  ;;  %1561 = vmatprep.subr.mxu0 %v1692_v11 }
 0x1ae   : > { %1531 = vmatpush3.xpose.msra.mxu1 %v669_v39  ;;  %1562 = vmatpush3.xpose.msra.mxu0 %v1930_v41 }
 0x1af   : > { %1532 = vmatprep.subr.mxu1 %v1692_v11  ;;  %1563 = vmatprep.subr.mxu0 %v1692_v11 }
 0x1b2   : > { %1533 = vmatpush3.xpose.msra.mxu1 %v676_v14  ;;  %1564 = vmatpush3.xpose.msra.mxu0 %v1952_v63 }
 0x1b3   : > { %1534 = vmatprep.subr.mxu1 %v1692_v11  ;;  %1565 = vmatprep.subr.mxu0 %v1692_v11 }
 0x1b6   : > { %1535 = vmatpush3.xpose.msra.mxu1 %v683_v3  ;;  %1566 = vmatpush3.xpose.msra.mxu0 %v1959_v6 }
 0x1b7   : > { %1536 = vmatprep.subr.mxu1 %v1692_v11  ;;  %1567 = vmatprep.subr.mxu0 %v1692_v11 }
 0x1ba   : > { %1537 = vmatpush3.xpose.msra.mxu1 %v690_v26  ;;  %1568 = vmatpush3.xpose.msra.mxu0 %v1976_v16 }
 0x1bb   : > { %1538 = vmatprep.subr.mxu1 %v1692_v11  ;;  %1569 = vmatprep.subr.mxu0 %v1692_v11 }
 0x1be   : > { %1539 = vmatpush3.xpose.msra.mxu1 %v697_v32  ;;  %1570 = vmatpush3.xpose.msra.mxu0 %v1992_v33 }
 0x1bf   : > { %1571 = vmatprep.subr.mxu0 %v1692_v11 }
 0x1c1   : > { %1541 = vmatmul.mubr.f32.vlgmr.msra.gmra.mxu1 %v2004_v49 }
 0x1c2   : > { %1572 = vmatpush3.xpose.msra.mxu0 %v2014_v56 }
 0x1c3   : > { %1573 = vmatprep.subr.mxu0 %v1692_v11 }
 0x1c6   : > { %1574 = vmatpush3.xpose.msra.mxu0 %v2023_v12 }
 0x1c9   : > { %1576 = vmatmul.mubr.f32.vlgmr.msra.gmra.mxu0 %v2004_v49 }
 0x201   : > { %v585_v34 = vpop.f32.mrf.mxu1 }
 0x202   : > { %v586_v47 = vadd.f32 %v585_v34, %v445_v43 }
 0x203   : > { %v1402_v44 = vpop.f32.mrf.mxu1 }
 0x209   : > { %v736_v48 = vpop.f32.mrf.mxu0 }
 0x20a   : > { %v737_v51 = vadd.f32 %v736_v48, %v586_v47 }
 0x20b   : > { %v1437_v52 = vpop.f32.mrf.mxu0 }
 0x241   : > { %v840_v53 = vpop.f32.mrf.mxu1 }
 0x242   : > { %v841_v54 = vadd.f32 %v840_v53, %v737_v51 }
 0x243   : > { %v1472_v59 = vpop.f32.mrf.mxu1 }
 0x249   : > { %v929_v60 = vpop.f32.mrf.mxu0 }
 0x24a   : > { %v930_v4 = vadd.f32 %v929_v60, %v841_v54 }
 0x24b   : > { %v1507_v61 = vpop.f32.mrf.mxu0 }
 0x281   : > { %v1048_v11 = vpop.f32.mrf.mxu1 }
 0x282   : > { %v1049_v5 = vadd.f32 %v1048_v11, %v930_v4 }
 0x283   : > { %v1542_v2 = vpop.f32.mrf.mxu1 }
 0x289   : > { %v1135_v18 = vpop.f32.mrf.mxu0 }
 0x28a   : > { %v1136_v21 = vadd.f32 %v1135_v18, %v1049_v5 }
 0x28b   : > { %v1577_v22 = vpop.f32.mrf.mxu0 }
 0x28c   : > { %1139 = vst [vmem:[%s218_s26] sm:$0x1] %v1136_v21 }
 0x28d   : > { %1643 = shalt.err (!%p1640_p3)
}
 0x28e   : > { %s1644_s10 = scalar_lea.hbm %s2224_s8, 16  ;;  %s1648_s17 = scalar_lea.hbm %s2264_s5, 48 }
 0x28f   : > { %p1645_p4 = scmp.ne.s32.totalorder %s2224_s8, %s1644_s10  ;;  %p1649_p9 = scmp.lt.s32.totalorder %s2224_s8, %s2264_s5 }
 0x290   : > { %p1650_p10 = scmp.lt.s32.totalorder %s1648_s17, %s1644_s10 }
 0x291   : > { %p1646_p7 = pnand %p1645_p4, %p1763_p5 }
 0x292   : > { %p1651_p11 = por %p1650_p10, %p1649_p9 }
 0x293   : > { %p1647_p8 = pneg %p1646_p7 }
 0x295   : > { %p1652_p12 = pnand %p1651_p11, %p1647_p8 }
 0x297   : > { %1655 = shalt.err (!%p1652_p12)
}
 0x298   : > { %1579 = dma.vmem_to_hbm [thread:$0]  (%p1763_p5), %s1154_s27, 16, %s2224_s8, %s1141_s9  }
 0x299 PF: > { %p1585_p13 = scmp.ge.s32.totalorder %s1690_s23, 2  ;;  %s1165_s4 = sand.u32 1, %s1678_s20  }
 0x29a   : > { %s1166_s24 = scalar_lea.sflag [#allocation4], %s1165_s4 }
 0x29b   : > { %p1582_p0 = pnand %p1585_p13, %p1767_p6 }
 0x29d   : > { %p1583_p1 = pneg %p1582_p0 }
 0x29f   : > { %1673 = dma.done.wait (%p1583_p1), %s1166_s24, 16  }
 0x2a0   : > { %1675 = vsyncadd (%p1583_p1), %s1166_s24, 4294967280  ;;  %p16_p2 = scmp.ge.s32.totalorder %s1751_s25, 5   ;;  %s2267_s20 = smov %s1682_s21 }
 0x2a1   : > { %s2268_s21 = smov %s1686_s22  ;;  %s2269_s22 = smov %s1761_s28 }
 0x2a2   : > { %s2270_s23 = smov %s1751_s25  ;;  %18 = sbr.rel (!%p16_p2) target bundleno = 5 (0x5), region = 75 }
 0x2a7   :  { %1170 = vsyncpa [#allocation4], 1 }
 0x2a8   :  { %1172 = vsyncpa [#allocation4 + $0x1], 1 }

</bundles_post_ra>
